<compile_context>
chip_gen: v7x
topology: tpu7x:2x2x1
jax: 0.10.0
libtpu: 0.0.40
codegen_flags: <defaults>
</compile_context>

<pallas_src>
import math
import jax
import jax.numpy as jnp
from jax.experimental import pallas as pl
from jax.experimental.pallas import tpu as pltpu

FREQ_DIM = 256          # frequency_embedding_size
HALF = FREQ_DIM // 2    # 128 -> lane aligned
HIDDEN = 32             # hidden_size (small example)
MAX_PERIOD = 10000.0


def _sincos(x):
    """Fused sin/cos with one shared range reduction (VPU-friendly).

    x: f32 array (here non-negative, |x| <~ 1e3 so 3-term Cody-Waite is ample).
    Returns (sin(x), cos(x)) to within ~2 ulp on the reduced range.
    """
    two_over_pi = 0.6366197723675814
    # Quadrant index k = round(x * 2/pi); shared between sin and cos.
    k = jnp.floor(x * two_over_pi + 0.5)
    # 3-term Cody-Waite reduction: r = x - k*pi/2, |r| <= pi/4.
    # (Cephes constants; k*DP1 and k*DP2 are exact in f32 for k up to ~2^10.)
    r = x - k * 1.5703125
    r = r - k * 4.837512969970703e-4
    r = r - k * 7.549789948768648e-8
    r2 = r * r
    # Minimax polynomials on [-pi/4, pi/4] (Cephes sinf/cosf coefficients).
    sin_p = ((-1.9515295891e-4 * r2 + 8.3321608736e-3) * r2
             - 1.6666654611e-1) * r2 * r + r
    cos_p = ((2.443315711809948e-5 * r2 - 1.388731625493765e-3) * r2
             + 4.166664568298827e-2) * (r2 * r2) - 0.5 * r2 + 1.0
    # Quadrant selection (two's-complement & handles negative k correctly).
    q = k.astype(jnp.int32) & 3
    sin_x = jnp.where(q == 0, sin_p,
            jnp.where(q == 1, cos_p,
            jnp.where(q == 2, -sin_p, -cos_p)))
    cos_x = jnp.where(q == 0, cos_p,
            jnp.where(q == 1, -sin_p,
            jnp.where(q == 2, -cos_p, sin_p)))
    return sin_x, cos_x


def timestep_embedder_kernel(t_ref, freqs_ref, w1c_ref, w1s_ref, b1_ref,
                             w2_ref, b2_ref, o_ref):
    # t_ref: (BN, 1) f32,  freqs_ref: (1, HALF) f32
    args = t_ref[...] * freqs_ref[...]          # (BN, HALF)

    sin_a, cos_a = _sincos(args)                # fused: one range reduction

    # Split first matmul instead of concatenating [cos, sin] on the lane axis.
    h = (jnp.dot(cos_a, w1c_ref[...], preferred_element_type=jnp.float32)
         + jnp.dot(sin_a, w1s_ref[...], preferred_element_type=jnp.float32)
         + b1_ref[...])

    # SiLU
    h = h * jax.nn.sigmoid(h)

    out = jnp.dot(h, w2_ref[...], preferred_element_type=jnp.float32) + b2_ref[...]
    # NOTE: at HIDDEN=32 the store is a masked vst (32/128 lanes). A lane-dense
    # repack ((bn,32)->(bn//4,128)) would cross an (8,128) tile boundary and
    # cost a relayout copy; skipped here, moot at real SEDD widths (>=128).
    o_ref[...] = out.astype(o_ref.dtype)


def _round_up(x, m):
    return ((x + m - 1) // m) * m


def _cdiv(a, b):
    return -(-a // b)


def _tile_rows(n, block_n):
    """Pick (bn, n_pad): padding bounded by <8 rows/tile, >=2 tiles for big N."""
    num_tiles = max(1, _cdiv(n, block_n))
    if n > 256:
        # Guarantee >=2 grid steps so v7x can shard the N axis across its 2 TCs.
        num_tiles = max(num_tiles, 2)
    bn = _round_up(_cdiv(n, num_tiles), 8)
    n_pad = _round_up(n, bn)
    return bn, n_pad


def timestep_embedder(t, w1, b1, w2, b2, *, block_n=2048):
    """t: (N,) f32.  w1: (FREQ_DIM, HIDDEN), b1: (HIDDEN,), w2: (HIDDEN, HIDDEN),
    b2: (HIDDEN,).  Returns (N, HIDDEN) f32."""
    n = t.shape[0]
    if n == 0:
        return jnp.zeros((0, HIDDEN), jnp.float32)

    bn, n_pad = _tile_rows(n, block_n)

    t2 = t.astype(jnp.float32).reshape(n, 1)
    if n_pad != n:
        t2 = jnp.pad(t2, ((0, n_pad - n), (0, 0)))   # zero-pad rows (sliced off)

    # Constant frequency table, computed once outside the kernel.
    freqs = jnp.exp(
        -math.log(MAX_PERIOD) * jnp.arange(HALF, dtype=jnp.float32) / HALF
    ).reshape(1, HALF)

    # Pre-split the first weight so the kernel needs no concat.
    w1_cos = w1[:HALF]            # (HALF, HIDDEN)
    w1_sin = w1[HALF:]            # (HALF, HIDDEN)
    b1_2 = b1.reshape(1, HIDDEN)
    b2_2 = b2.reshape(1, HIDDEN)

    grid = (n_pad // bn,)

    # Rough per-call cost hint for XLA's scheduler.
    flops = n_pad * (2 * 2 * HALF * HIDDEN       # split first matmul
                     + 2 * HIDDEN * HIDDEN       # second matmul
                     + 20 * HALF)                # sincos polynomials (VPU)
    bytes_accessed = (n_pad * 4                  # t
                      + n_pad * HIDDEN * 4       # out
                      + (FREQ_DIM * HIDDEN + HIDDEN * HIDDEN + 2 * HIDDEN + HALF) * 4)
    cost = pl.CostEstimate(flops=flops,
                           transcendentals=n_pad * HIDDEN,   # sigmoid (EUP)
                           bytes_accessed=bytes_accessed)

    out = pl.pallas_call(
        timestep_embedder_kernel,
        out_shape=jax.ShapeDtypeStruct((n_pad, HIDDEN), jnp.float32),
        grid_spec=pltpu.PrefetchScalarGridSpec(
            num_scalar_prefetch=0,
            grid=grid,
            in_specs=[
                pl.BlockSpec((bn, 1), lambda i: (i, 0)),          # t
                pl.BlockSpec((1, HALF), lambda i: (0, 0)),        # freqs (resident)
                pl.BlockSpec((HALF, HIDDEN), lambda i: (0, 0)),   # w1_cos (resident)
                pl.BlockSpec((HALF, HIDDEN), lambda i: (0, 0)),   # w1_sin (resident)
                pl.BlockSpec((1, HIDDEN), lambda i: (0, 0)),      # b1 (resident)
                pl.BlockSpec((HIDDEN, HIDDEN), lambda i: (0, 0)), # w2 (resident)
                pl.BlockSpec((1, HIDDEN), lambda i: (0, 0)),      # b2 (resident)
            ],
            out_specs=pl.BlockSpec((bn, HIDDEN), lambda i: (i, 0)),
        ),
        compiler_params=pltpu.CompilerParams(
            dimension_semantics=("parallel",),   # v7x: shard N across both TCs
            vmem_limit_bytes=64 << 20,
        ),
        cost_estimate=cost,
    )(t2, freqs, w1_cos, w1_sin, b1_2, w2, b2_2)

    return out[:n]


def reference(t, w1, b1, w2, b2):
    """Pure-JAX reference mirroring the PyTorch module."""
    half = FREQ_DIM // 2
    freqs = jnp.exp(-math.log(MAX_PERIOD) * jnp.arange(half, dtype=jnp.float32) / half)
    args = t.astype(jnp.float32)[:, None] * freqs[None, :]
    emb = jnp.concatenate([jnp.cos(args), jnp.sin(args)], axis=-1)
    h = emb @ w1 + b1
    h = h * jax.nn.sigmoid(h)
    return h @ w2 + b2


if __name__ == "__main__":
    key = jax.random.PRNGKey(0)
    k_t, k_w1, k_b1, k_w2, k_b2 = jax.random.split(key, 5)

    N = 8  # batch of timesteps
    t = jax.random.uniform(k_t, (N,), dtype=jnp.float32) * 1000.0

    # Deterministic parameter init (shapes from nn.Linear(256, H) / nn.Linear(H, H),
    # pre-transposed to (in, out)).
    w1 = jax.random.normal(k_w1, (FREQ_DIM, HIDDEN), dtype=jnp.float32) * 0.02
    b1 = jax.random.normal(k_b1, (HIDDEN,), dtype=jnp.float32) * 0.02
    w2 = jax.random.normal(k_w2, (HIDDEN, HIDDEN), dtype=jnp.float32) * 0.02
    b2 = jax.random.normal(k_b2, (HIDDEN,), dtype=jnp.float32) * 0.02

    out = timestep_embedder(t, w1, b1, w2, b2)
    jax.block_until_ready(out)

    ref = reference(t, w1, b1, w2, b2)
    assert out.shape == (N, HIDDEN)
    assert jnp.allclose(out, ref, atol=1e-4, rtol=1e-4), "mismatch vs reference"

    print("KERNEL_OK")
</pallas_src>

<mosaic_0001>
module attributes {stable_mosaic.version = 11 : i64} {
  func.func @timestep_embedder_kernel(%arg0: i32, %arg1: memref<8x1xf32, #tpu.memory_space<vmem>>, %arg2: memref<1x128xf32, #tpu.memory_space<vmem>>, %arg3: memref<128x32xf32, #tpu.memory_space<vmem>>, %arg4: memref<128x32xf32, #tpu.memory_space<vmem>>, %arg5: memref<1x32xf32, #tpu.memory_space<vmem>>, %arg6: memref<32x32xf32, #tpu.memory_space<vmem>>, %arg7: memref<1x32xf32, #tpu.memory_space<vmem>>, %arg8: memref<8x32xf32, #tpu.memory_space<vmem>>) attributes {dimension_semantics = [#tpu.dimension_semantics<parallel>], iteration_bounds = array<i64: 1>, scalar_prefetch = 0 : i64, scratch_operands = 0 : i64, tpu.core_type = #tpu.core_type<tc>, window_params = [{transform_indices = @transform_0, window_bounds = array<i64: 8, 1>}, {pipeline_mode = #tpu.pipeline_mode<synchronous>, transform_indices = @transform_1, window_bounds = array<i64: 1, 128>}, {pipeline_mode = #tpu.pipeline_mode<synchronous>, transform_indices = @transform_2, window_bounds = array<i64: 128, 32>}, {pipeline_mode = #tpu.pipeline_mode<synchronous>, transform_indices = @transform_3, window_bounds = array<i64: 128, 32>}, {pipeline_mode = #tpu.pipeline_mode<synchronous>, transform_indices = @transform_4, window_bounds = array<i64: 1, 32>}, {pipeline_mode = #tpu.pipeline_mode<synchronous>, transform_indices = @transform_5, window_bounds = array<i64: 32, 32>}, {pipeline_mode = #tpu.pipeline_mode<synchronous>, transform_indices = @transform_6, window_bounds = array<i64: 1, 32>}, {transform_indices = @transform_7, window_bounds = array<i64: 8, 32>}]} {
    %c0 = arith.constant 0 : index
    %c0_0 = arith.constant 0 : index
    %0 = vector.load %arg1[%c0, %c0_0] : memref<8x1xf32, #tpu.memory_space<vmem>>, vector<8x1xf32>
    %c0_1 = arith.constant 0 : index
    %c0_2 = arith.constant 0 : index
    %1 = vector.load %arg2[%c0_1, %c0_2] : memref<1x128xf32, #tpu.memory_space<vmem>>, vector<1x128xf32>
    %2 = vector.broadcast %0 : vector<8x1xf32> to vector<8x128xf32>
    %3 = vector.broadcast %1 : vector<1x128xf32> to vector<8x128xf32>
    %4 = arith.mulf %2, %3 : vector<8x128xf32>
    %cst = arith.constant 0.636619746 : f32
    %5 = vector.broadcast %cst : f32 to vector<8x128xf32>
    %6 = arith.mulf %4, %5 : vector<8x128xf32>
    %cst_3 = arith.constant 5.000000e-01 : f32
    %7 = vector.broadcast %cst_3 : f32 to vector<8x128xf32>
    %8 = arith.addf %6, %7 : vector<8x128xf32>
    %9 = math.floor %8 : vector<8x128xf32>
    %cst_4 = arith.constant 1.5703125 : f32
    %10 = vector.broadcast %cst_4 : f32 to vector<8x128xf32>
    %11 = arith.mulf %9, %10 : vector<8x128xf32>
    %12 = arith.subf %4, %11 : vector<8x128xf32>
    %cst_5 = arith.constant 4.83751297E-4 : f32
    %13 = vector.broadcast %cst_5 : f32 to vector<8x128xf32>
    %14 = arith.mulf %9, %13 : vector<8x128xf32>
    %15 = arith.subf %12, %14 : vector<8x128xf32>
    %cst_6 = arith.constant 7.549790e-08 : f32
    %16 = vector.broadcast %cst_6 : f32 to vector<8x128xf32>
    %17 = arith.mulf %9, %16 : vector<8x128xf32>
    %18 = arith.subf %15, %17 : vector<8x128xf32>
    %19 = arith.mulf %18, %18 : vector<8x128xf32>
    %cst_7 = arith.constant -1.95152956E-4 : f32
    %20 = vector.broadcast %cst_7 : f32 to vector<8x128xf32>
    %21 = arith.mulf %20, %19 : vector<8x128xf32>
    %cst_8 = arith.constant 0.00833216123 : f32
    %22 = vector.broadcast %cst_8 : f32 to vector<8x128xf32>
    %23 = arith.addf %21, %22 : vector<8x128xf32>
    %24 = arith.mulf %23, %19 : vector<8x128xf32>
    %cst_9 = arith.constant 0.166666552 : f32
    %25 = vector.broadcast %cst_9 : f32 to vector<8x128xf32>
    %26 = arith.subf %24, %25 : vector<8x128xf32>
    %27 = arith.mulf %26, %19 : vector<8x128xf32>
    %28 = arith.mulf %27, %18 : vector<8x128xf32>
    %29 = arith.addf %28, %18 : vector<8x128xf32>
    %cst_10 = arith.constant 2.44331568E-5 : f32
    %30 = vector.broadcast %cst_10 : f32 to vector<8x128xf32>
    %31 = arith.mulf %30, %19 : vector<8x128xf32>
    %cst_11 = arith.constant 0.00138873165 : f32
    %32 = vector.broadcast %cst_11 : f32 to vector<8x128xf32>
    %33 = arith.subf %31, %32 : vector<8x128xf32>
    %34 = arith.mulf %33, %19 : vector<8x128xf32>
    %cst_12 = arith.constant 0.0416666456 : f32
    %35 = vector.broadcast %cst_12 : f32 to vector<8x128xf32>
    %36 = arith.addf %34, %35 : vector<8x128xf32>
    %37 = arith.mulf %19, %19 : vector<8x128xf32>
    %38 = arith.mulf %36, %37 : vector<8x128xf32>
    %cst_13 = arith.constant 5.000000e-01 : f32
    %39 = vector.broadcast %cst_13 : f32 to vector<8x128xf32>
    %40 = arith.mulf %39, %19 : vector<8x128xf32>
    %41 = arith.subf %38, %40 : vector<8x128xf32>
    %cst_14 = arith.constant 1.000000e+00 : f32
    %42 = vector.broadcast %cst_14 : f32 to vector<8x128xf32>
    %43 = arith.addf %41, %42 : vector<8x128xf32>
    %44 = arith.fptosi %9 : vector<8x128xf32> to vector<8x128xi32>
    %c3_i32 = arith.constant 3 : i32
    %45 = vector.broadcast %c3_i32 : i32 to vector<8x128xi32>
    %46 = arith.andi %44, %45 : vector<8x128xi32>
    %c0_i32 = arith.constant 0 : i32
    %47 = vector.broadcast %c0_i32 : i32 to vector<8x128xi32>
    %48 = arith.cmpi eq, %46, %47 : vector<8x128xi32>
    %c1_i32 = arith.constant 1 : i32
    %49 = vector.broadcast %c1_i32 : i32 to vector<8x128xi32>
    %50 = arith.cmpi eq, %46, %49 : vector<8x128xi32>
    %c2_i32 = arith.constant 2 : i32
    %51 = vector.broadcast %c2_i32 : i32 to vector<8x128xi32>
    %52 = arith.cmpi eq, %46, %51 : vector<8x128xi32>
    %cst_15 = arith.constant 0.000000e+00 : f32
    %53 = vector.broadcast %cst_15 : f32 to vector<8x128xf32>
    %54 = arith.subf %53, %29 : vector<8x128xf32>
    %cst_16 = arith.constant 0.000000e+00 : f32
    %55 = vector.broadcast %cst_16 : f32 to vector<8x128xf32>
    %56 = arith.subf %55, %43 : vector<8x128xf32>
    %57 = arith.select %52, %54, %56 : vector<8x128xi1>, vector<8x128xf32>
    %58 = arith.select %50, %43, %57 : vector<8x128xi1>, vector<8x128xf32>
    %59 = arith.select %48, %29, %58 : vector<8x128xi1>, vector<8x128xf32>
    %c0_i32_17 = arith.constant 0 : i32
    %60 = vector.broadcast %c0_i32_17 : i32 to vector<8x128xi32>
    %61 = arith.cmpi eq, %46, %60 : vector<8x128xi32>
    %c1_i32_18 = arith.constant 1 : i32
    %62 = vector.broadcast %c1_i32_18 : i32 to vector<8x128xi32>
    %63 = arith.cmpi eq, %46, %62 : vector<8x128xi32>
    %cst_19 = arith.constant 0.000000e+00 : f32
    %64 = vector.broadcast %cst_19 : f32 to vector<8x128xf32>
    %65 = arith.subf %64, %29 : vector<8x128xf32>
    %c2_i32_20 = arith.constant 2 : i32
    %66 = vector.broadcast %c2_i32_20 : i32 to vector<8x128xi32>
    %67 = arith.cmpi eq, %46, %66 : vector<8x128xi32>
    %cst_21 = arith.constant 0.000000e+00 : f32
    %68 = vector.broadcast %cst_21 : f32 to vector<8x128xf32>
    %69 = arith.subf %68, %43 : vector<8x128xf32>
    %70 = arith.select %67, %69, %29 : vector<8x128xi1>, vector<8x128xf32>
    %71 = arith.select %63, %65, %70 : vector<8x128xi1>, vector<8x128xf32>
    %72 = arith.select %61, %43, %71 : vector<8x128xi1>, vector<8x128xf32>
    %c0_22 = arith.constant 0 : index
    %c0_23 = arith.constant 0 : index
    %73 = vector.load %arg3[%c0_22, %c0_23] : memref<128x32xf32, #tpu.memory_space<vmem>>, vector<128x32xf32>
    %cst_24 = arith.constant dense<0.000000e+00> : vector<8x32xf32>
    %74 = tpu.matmul %72, %73, %cst_24 {dimension_numbers = #tpu.dot_dimension_numbers<[1], [0], [0], [1], [0, 0, 1, 1], [], []>} : vector<8x128xf32>, vector<128x32xf32>, vector<8x32xf32> -> vector<8x32xf32>
    %c0_25 = arith.constant 0 : index
    %c0_26 = arith.constant 0 : index
    %75 = vector.load %arg4[%c0_25, %c0_26] : memref<128x32xf32, #tpu.memory_space<vmem>>, vector<128x32xf32>
    %cst_27 = arith.constant dense<0.000000e+00> : vector<8x32xf32>
    %76 = tpu.matmul %59, %75, %cst_27 {dimension_numbers = #tpu.dot_dimension_numbers<[1], [0], [0], [1], [0, 0, 1, 1], [], []>} : vector<8x128xf32>, vector<128x32xf32>, vector<8x32xf32> -> vector<8x32xf32>
    %77 = arith.addf %74, %76 : vector<8x32xf32>
    %c0_28 = arith.constant 0 : index
    %c0_29 = arith.constant 0 : index
    %78 = vector.load %arg5[%c0_28, %c0_29] : memref<1x32xf32, #tpu.memory_space<vmem>>, vector<1x32xf32>
    %79 = vector.broadcast %78 : vector<1x32xf32> to vector<8x32xf32>
    %80 = arith.addf %77, %79 : vector<8x32xf32>
    %81 = arith.negf %80 : vector<8x32xf32>
    %82 = math.exp %81 : vector<8x32xf32>
    %cst_30 = arith.constant 1.000000e+00 : f32
    %83 = vector.broadcast %cst_30 : f32 to vector<8x32xf32>
    %84 = arith.addf %83, %82 : vector<8x32xf32>
    %85 = arith.divf %83, %84 : vector<8x32xf32>
    %86 = arith.mulf %80, %85 : vector<8x32xf32>
    %c0_31 = arith.constant 0 : index
    %c0_32 = arith.constant 0 : index
    %87 = vector.load %arg6[%c0_31, %c0_32] : memref<32x32xf32, #tpu.memory_space<vmem>>, vector<32x32xf32>
    %cst_33 = arith.constant dense<0.000000e+00> : vector<8x32xf32>
    %88 = tpu.matmul %86, %87, %cst_33 {dimension_numbers = #tpu.dot_dimension_numbers<[1], [0], [0], [1], [0, 0, 1, 1], [], []>} : vector<8x32xf32>, vector<32x32xf32>, vector<8x32xf32> -> vector<8x32xf32>
    %c0_34 = arith.constant 0 : index
    %c0_35 = arith.constant 0 : index
    %89 = vector.load %arg7[%c0_34, %c0_35] : memref<1x32xf32, #tpu.memory_space<vmem>>, vector<1x32xf32>
    %90 = vector.broadcast %89 : vector<1x32xf32> to vector<8x32xf32>
    %91 = arith.addf %88, %90 : vector<8x32xf32>
    %c0_36 = arith.constant 0 : index
    %c0_37 = arith.constant 0 : index
    %92 = vector.load %arg8[%c0_36, %c0_37] : memref<8x32xf32, #tpu.memory_space<vmem>>, vector<8x32xf32>
    tpu.vector_store %arg8[%c0_36, %c0_37], %91 {strides = array<i32>} : memref<8x32xf32, #tpu.memory_space<vmem>>, vector<8x32xf32>,
    return
  }
  func.func @transform_0(%arg0: i32) -> (i32, i32) {
    %c0_i32 = arith.constant 0 : i32
    %c0_i32_0 = arith.constant 0 : i32
    return %arg0, %c0_i32 : i32, i32
  }
  func.func @transform_1(%arg0: i32) -> (i32, i32) {
    %c0_i32 = arith.constant 0 : i32
    %c0_i32_0 = arith.constant 0 : i32
    %c0_i32_1 = arith.constant 0 : i32
    return %c0_i32, %c0_i32_0 : i32, i32
  }
  func.func @transform_2(%arg0: i32) -> (i32, i32) {
    %c0_i32 = arith.constant 0 : i32
    %c0_i32_0 = arith.constant 0 : i32
    %c0_i32_1 = arith.constant 0 : i32
    return %c0_i32, %c0_i32_0 : i32, i32
  }
  func.func @transform_3(%arg0: i32) -> (i32, i32) {
    %c0_i32 = arith.constant 0 : i32
    %c0_i32_0 = arith.constant 0 : i32
    %c0_i32_1 = arith.constant 0 : i32
    return %c0_i32, %c0_i32_0 : i32, i32
  }
  func.func @transform_4(%arg0: i32) -> (i32, i32) {
    %c0_i32 = arith.constant 0 : i32
    %c0_i32_0 = arith.constant 0 : i32
    %c0_i32_1 = arith.constant 0 : i32
    return %c0_i32, %c0_i32_0 : i32, i32
  }
  func.func @transform_5(%arg0: i32) -> (i32, i32) {
    %c0_i32 = arith.constant 0 : i32
    %c0_i32_0 = arith.constant 0 : i32
    %c0_i32_1 = arith.constant 0 : i32
    return %c0_i32, %c0_i32_0 : i32, i32
  }
  func.func @transform_6(%arg0: i32) -> (i32, i32) {
    %c0_i32 = arith.constant 0 : i32
    %c0_i32_0 = arith.constant 0 : i32
    %c0_i32_1 = arith.constant 0 : i32
    return %c0_i32, %c0_i32_0 : i32, i32
  }
  func.func @transform_7(%arg0: i32) -> (i32, i32) {
    %c0_i32 = arith.constant 0 : i32
    %c0_i32_0 = arith.constant 0 : i32
    return %arg0, %c0_i32 : i32, i32
  }
}

</mosaic_0001>

<bundles_post_ra>
// kernel: tpu_custom_call.1
= control target key start
LH: loop header
LB: loop body
LE: loop exit
PB: predicated region body
PF: predicated region fallthrough
CT: control target
= control target key end

     0   :  { %12 = vsyncpa [#allocation3], 0  ;;  %s1029_s0 = inlined_call_operand.hbm [shape: f32[8,1], index: 0, kind: input, shape index: {}]   ;;  %s1030_s1 = inlined_call_operand.hbm [shape: f32[1,128], index: 1, kind: input, shape index: {}]   ;;  %s1031_s2 = inlined_call_operand.hbm [shape: f32[128,32], index: 2, kind: input, shape index: {}]   ;;  %s1032_s3 = inlined_call_operand.hbm [shape: f32[128,32], index: 3, kind: input, shape index: {}]   ;;  %s1033_s4 = inlined_call_operand.hbm [shape: f32[1,32], index: 4, kind: input, shape index: {}]   ;;  %s1034_s5 = inlined_call_operand.hbm [shape: f32[32,32], index: 5, kind: input, shape index: {}]   ;;  %s1035_s6 = inlined_call_operand.hbm [shape: f32[1,32], index: 6, kind: input, shape index: {}]   ;;  %s1036_s7 = inlined_call_operand.hbm [shape: f32[8,32], index: 7, kind: output, shape index: {}]  }
   0x1   :  { %13 = vsyncpa [#allocation6], 0 }
   0x2   :  { %14 = vsyncpa [#allocation9], 0 }
   0x3   :  { %15 = vsyncpa [#allocation12], 0 }
   0x4   :  { %16 = vsyncpa [#allocation4], 0  ;;  %s846_s24 = smov [#allocation5]   ;;  %s660_s28 = scalar_lea.hbm %s1030_s1, 16 }
   0x5   :  { %s33_s25 = sshll.u32 %s846_s24, 4  ;;  %p661_p0 = scmp.ne.s32.totalorder %s1030_s1, %s660_s28  ;;  %s34_s25 = int_to_ptr.vmem [resolvable:$true] %s33_s25 }
   0x6   :  { %p664_p1 = scmp.lt.u32.totalorder %s660_s28, %s1030_s1 }
   0x8   :  { %p666_p2 = pnand %p664_p1, %p661_p0 }
   0xa   :  { %669 = shalt.err (!%p666_p2)
}
   0xb   :  { %s670_s10 = scalar_lea.vmem %s34_s25, 16  ;;  %s674_s11 = scalar_lea.vmem %s34_s25, 32 }
   0xc   :  { %p671_p3 = scmp.ne.s32.totalorder %s34_s25, %s670_s10  ;;  %p675_p4 = scmp.lt.s32.totalorder %s34_s25, %s34_s25 }
   0xd   :  { %p676_p5 = scmp.lt.s32.totalorder %s674_s11, %s670_s10 }
   0xf   :  { %p677_p6 = por %p676_p5, %p675_p4 }
  0x11   :  { %p678_p7 = pnand %p677_p6, %p671_p3 }
  0x13   :  { %681 = shalt.err (!%p678_p7)
}
  0x14   :  { %36 = dma.hbm_to_vmem [thread:$0]  %s1030_s1, 16, %s34_s25, [#allocation6]  }
  0x15   :  { %s847_s14 = smov [#allocation8]   ;;  %s848_s16 = smov [#allocation11]  }
  0x16   :  { %s54_s15 = sshll.u32 %s847_s14, 4  ;;  %s76_s17 = sshll.u32 %s848_s16, 4  ;;  %s55_s15 = int_to_ptr.vmem [resolvable:$true] %s54_s15  ;;  %s77_s17 = int_to_ptr.vmem [resolvable:$true] %s76_s17 }
  0x17   :  { %s682_s20 = scalar_lea.hbm %s1032_s3, 2048 }
  0x18   :  { %p683_p8 = scmp.ne.s32.totalorder %s1032_s3, %s682_s20  ;;  %p686_p9 = scmp.lt.u32.totalorder %s682_s20, %s1032_s3 }
  0x1a   :  { %p688_p10 = pnand %p686_p9, %p683_p8 }
  0x1c   :  { %691 = shalt.err (!%p688_p10)
}
  0x1d   :  { %s692_s1 = scalar_lea.vmem %s55_s15, 2048  ;;  %p697_p12 = scmp.lt.s32.totalorder %s55_s15, %s55_s15 }
  0x1e   :  { %p693_p11 = scmp.ne.s32.totalorder %s55_s15, %s692_s1  ;;  %p698_p13 = scmp.lt.s32.totalorder %s692_s1, %s692_s1 }
  0x20   :  { %p699_p0 = por %p698_p13, %p697_p12 }
  0x22   :  { %p700_p1 = pnand %p699_p0, %p693_p11 }
  0x24   :  { %703 = shalt.err (!%p700_p1)
}
  0x25   :  { %s849_s25 = smov 128   ;;  %s850_s26 = smov 8  }
  0x26   :  { %60 = dma.hbm_to_vmem [thread:$0]  %s1032_s3, 2048, %s55_s15, [#allocation9], %s849_s25, %s849_s25, %s850_s26  }
  0x27   :  { %s704_s8 = scalar_lea.hbm %s1034_s5, 512 }
  0x28   :  { %p705_p2 = scmp.ne.s32.totalorder %s1034_s5, %s704_s8  ;;  %p708_p3 = scmp.lt.u32.totalorder %s704_s8, %s1034_s5 }
  0x2a   :  { %p710_p4 = pnand %p708_p3, %p705_p2 }
  0x2c   :  { %713 = shalt.err (!%p710_p4)
}
  0x2d   :  { %s714_s13 = scalar_lea.vmem %s77_s17, 512  ;;  %p719_p6 = scmp.lt.s32.totalorder %s77_s17, %s77_s17 }
  0x2e   :  { %p715_p5 = scmp.ne.s32.totalorder %s77_s17, %s714_s13  ;;  %p720_p7 = scmp.lt.s32.totalorder %s714_s13, %s714_s13 }
  0x30   :  { %p721_p8 = por %p720_p7, %p719_p6 }
  0x32   :  { %p722_p9 = pnand %p721_p8, %p715_p5 }
  0x34   :  { %725 = shalt.err (!%p722_p9)
}
  0x35   :  { %82 = dma.hbm_to_vmem [thread:$0]  %s1034_s5, 512, %s77_s17, [#allocation12], %s849_s25, %s849_s25, %s850_s26  }
  0x36   :  { %s851_s15 = smov [#allocation2]   ;;  %s852_s18 = smov [#allocation7]  }
  0x37   :  { %s23_s16 = sshll.u32 %s851_s15, 4  ;;  %s42_s19 = sshll.u32 %s852_s18, 4  ;;  %s24_s16 = int_to_ptr.vmem [resolvable:$true] %s23_s16  ;;  %s43_s19 = int_to_ptr.vmem [resolvable:$true] %s42_s19 }
  0x38   :  { %s726_s22 = scalar_lea.hbm %s1029_s0, 128 }
  0x39   :  { %p727_p10 = scmp.ne.s32.totalorder %s1029_s0, %s726_s22  ;;  %p730_p11 = scmp.lt.u32.totalorder %s726_s22, %s1029_s0 }
  0x3b   :  { %p732_p12 = pnand %p730_p11, %p727_p10 }
  0x3d   :  { %735 = shalt.err (!%p732_p12)
}
  0x3e   :  { %s736_s5 = scalar_lea.vmem %s24_s16, 128  ;;  %p741_p0 = scmp.lt.s32.totalorder %s24_s16, %s24_s16 }
  0x3f   :  { %p737_p13 = scmp.ne.s32.totalorder %s24_s16, %s736_s5  ;;  %p742_p1 = scmp.lt.s32.totalorder %s736_s5, %s736_s5 }
  0x41   :  { %p743_p2 = por %p742_p1, %p741_p0 }
  0x43   :  { %p744_p3 = pnand %p743_p2, %p737_p13 }
  0x45   :  { %747 = shalt.err (!%p744_p3)
}
  0x46   :  { %26 = dma.hbm_to_vmem [thread:$0]  %s1029_s0, 128, %s24_s16, [#allocation3]  }
  0x47   :  { %s748_s8 = scalar_lea.hbm %s1031_s2, 2048 }
  0x48   :  { %p749_p4 = scmp.ne.s32.totalorder %s1031_s2, %s748_s8  ;;  %p752_p5 = scmp.lt.u32.totalorder %s748_s8, %s1031_s2 }
  0x4a   :  { %p754_p6 = pnand %p752_p5, %p749_p4 }
  0x4c   :  { %757 = shalt.err (!%p754_p6)
}
  0x4d   :  { %s758_s13 = scalar_lea.vmem %s43_s19, 2048  ;;  %p763_p8 = scmp.lt.s32.totalorder %s43_s19, %s43_s19 }
  0x4e   :  { %p759_p7 = scmp.ne.s32.totalorder %s43_s19, %s758_s13  ;;  %p764_p9 = scmp.lt.s32.totalorder %s758_s13, %s758_s13 }
  0x50   :  { %p765_p10 = por %p764_p9, %p763_p8 }
  0x52   :  { %p766_p11 = pnand %p765_p10, %p759_p7 }
  0x54   :  { %769 = shalt.err (!%p766_p11)
}
  0x55   :  { %48 = dma.hbm_to_vmem [thread:$0]  %s1031_s2, 2048, %s43_s19, [#allocation6], %s849_s25, %s849_s25, %s850_s26  }
  0x56   :  { %s853_s14 = smov [#allocation10]   ;;  %s854_s16 = smov [#allocation13]  }
  0x57   :  { %s67_s15 = sshll.u32 %s853_s14, 4  ;;  %s89_s18 = sshll.u32 %s854_s16, 4  ;;  %s68_s15 = int_to_ptr.vmem [resolvable:$true] %s67_s15  ;;  %s90_s18 = int_to_ptr.vmem [resolvable:$true] %s89_s18 }
  0x58   :  { %s770_s22 = scalar_lea.hbm %s1033_s4, 16 }
  0x59   :  { %p771_p12 = scmp.ne.s32.totalorder %s1033_s4, %s770_s22  ;;  %p774_p13 = scmp.lt.u32.totalorder %s770_s22, %s1033_s4 }
  0x5b   :  { %p776_p0 = pnand %p774_p13, %p771_p12 }
  0x5d   :  { %779 = shalt.err (!%p776_p0)
}
  0x5e   :  { %s780_s2 = scalar_lea.vmem %s68_s15, 16  ;;  %s784_s25 = scalar_lea.vmem %s68_s15, 32 }
  0x5f   :  { %p781_p1 = scmp.ne.s32.totalorder %s68_s15, %s780_s2  ;;  %p785_p2 = scmp.lt.s32.totalorder %s68_s15, %s68_s15 }
  0x60   :  { %p786_p3 = scmp.lt.s32.totalorder %s784_s25, %s780_s2 }
  0x62   :  { %p787_p4 = por %p786_p3, %p785_p2 }
  0x64   :  { %p788_p5 = pnand %p787_p4, %p781_p1 }
  0x66   :  { %791 = shalt.err (!%p788_p5)
}
  0x67   :  { %70 = dma.hbm_to_vmem [thread:$0]  %s1033_s4, 16, %s68_s15, [#allocation9]  }
  0x68   :  { %s792_s28 = scalar_lea.hbm %s1035_s6, 16 }
  0x69   :  { %p793_p6 = scmp.ne.s32.totalorder %s1035_s6, %s792_s28  ;;  %p796_p7 = scmp.lt.u32.totalorder %s792_s28, %s1035_s6 }
  0x6b   :  { %p798_p8 = pnand %p796_p7, %p793_p6 }
  0x6d   :  { %801 = shalt.err (!%p798_p8)
}
  0x6e   :  { %s802_s10 = scalar_lea.vmem %s90_s18, 16  ;;  %s806_s11 = scalar_lea.vmem %s90_s18, 32 }
  0x6f   :  { %p803_p9 = scmp.ne.s32.totalorder %s90_s18, %s802_s10  ;;  %p807_p10 = scmp.lt.s32.totalorder %s90_s18, %s90_s18 }
  0x70   :  { %p808_p11 = scmp.lt.s32.totalorder %s806_s11, %s802_s10 }
  0x72   :  { %p809_p12 = por %p808_p11, %p807_p10 }
  0x74   :  { %p810_p13 = pnand %p809_p12, %p803_p9 }
  0x76   :  { %813 = shalt.err (!%p810_p13)
}
  0x77   :  { %92 = dma.hbm_to_vmem [thread:$0]  %s1035_s6, 16, %s90_s18, [#allocation12]  }
  0x78   :  { %836 = dma.done.wait [#allocation3], 128  }
  0x79   :  { %837 = vsyncadd [#allocation3], 4294967168 }
  0x7a   :  { %838 = dma.done.wait [#allocation6], 2064  }
  0x7b   :  { %839 = vsyncadd [#allocation6], 4294965232 }
  0x7c   :  { %840 = dma.done.wait [#allocation9], 2064  }
  0x7d   :  { %841 = vsyncadd [#allocation9], 4294965232 }
  0x7e   :  { %842 = dma.done.wait [#allocation12], 528  }
  0x7f   :  { %843 = vsyncadd [#allocation12], 4294966768  ;;  %v855_v0 = vmov 0   ;;  %v114_v1 = vld [vmem:[#allocation2] sm:$0xff]  ;;  %v183_v2 = vld [vmem:[#allocation8] sm:$0xff]  ;;  %v856_v7 = vmov 0.0|0.0  }
  0x80   :  { %655 = vset.pattern.permute.xlu0 %v855_v0  ;;  %v184_v3 = vld [vmem:[#allocation8 + $0x8] sm:$0xff]  ;;  %v167_v4 = vld [vmem:[#allocation7] sm:$0xff]  ;;  %585 = vmatprep.subr.bf16.mxu0 %v856_v7  ;;  %v185_v9 = vld [vmem:[#allocation8 + $0x10] sm:$0xff]  ;;  %vm857_vm0 = vmmov 0   ;;  %v858_v31 = vmov 0.0   ;;  %vm365_vm4 = vcmask 261120  }
  0x81   :  { %118 = vperm.xlu0 %655, %v114_v1   ;;  %v586_v5 = vpack.c.bf16 %v184_v3, %v183_v2  ;;  %v168_v6 = vld [vmem:[#allocation7 + $0x8] sm:$0xff]  ;;  %609 = vmatprep.subr.bf16.mxu1 %v856_v7  ;;  %v186_v10 = vld [vmem:[#allocation8 + $0x18] sm:$0xff]  ;;  %v169_v11 = vld [vmem:[#allocation7 + $0x10] sm:$0xff]  ;;  %s859_s6 = smov [#allocation14]  }
  0x82   :  { %v610_v8 = vpack.c.bf16 %v168_v6, %v167_v4  ;;  %v589_v12 = vpack.c.bf16 %v186_v10, %v185_v9  ;;  %v170_v13 = vld [vmem:[#allocation7 + $0x18] sm:$0xff]  ;;  %v187_v15 = vld [vmem:[#allocation8 + $0x20] sm:$0xff]  ;;  %v188_v16 = vld [vmem:[#allocation8 + $0x28] sm:$0xff]  ;;  %536 = vmatprep.mubr.msk.f32.mxu0 %vm857_vm0, %v858_v31  ;;  %571 = vmatprep.mubr.msk.f32.mxu1 %vm857_vm0, %v858_v31  ;;  %s446_s13 = sshll.u32 %s859_s6, 4  ;;  %s447_s13 = int_to_ptr.vmem [resolvable:$true] %s446_s13 }
  0x83   :  { %587 = vmatpush3.bf16.msra.mxu0 %v586_v5  ;;  %v613_v14 = vpack.c.bf16 %v170_v13, %v169_v11  ;;  %v171_v17 = vld [vmem:[#allocation7 + $0x20] sm:$0xff]  ;;  %v592_v18 = vpack.c.bf16 %v188_v16, %v187_v15  ;;  %v172_v19 = vld [vmem:[#allocation7 + $0x28] sm:$0xff]  ;;  %v189_v21 = vld [vmem:[#allocation8 + $0x30] sm:$0xff]  ;;  %s814_s0 = scalar_lea.vmem %s447_s13, 128  ;;  %p819_p1 = scmp.lt.s32.totalorder %s447_s13, %s447_s13 }
  0x84   :  { %611 = vmatpush3.bf16.msra.mxu1 %v610_v8  ;;  %588 = vmatprep.subr.bf16.mxu0 %v856_v7  ;;  %v616_v20 = vpack.c.bf16 %v172_v19, %v171_v17  ;;  %v190_v22 = vld [vmem:[#allocation8 + $0x38] sm:$0xff]  ;;  %v173_v23 = vld [vmem:[#allocation7 + $0x30] sm:$0xff]  ;;  %v191_v26 = vld [vmem:[#allocation8 + $0x40] sm:$0xff]  ;;  %p815_p0 = scmp.ne.s32.totalorder %s447_s13, %s814_s0  ;;  %p820_p2 = scmp.lt.s32.totalorder %s814_s0, %s814_s0 }
  0x85   :  { %612 = vmatprep.subr.bf16.mxu1 %v856_v7  ;;  %v595_v24 = vpack.c.bf16 %v190_v22, %v189_v21  ;;  %v174_v25 = vld [vmem:[#allocation7 + $0x38] sm:$0xff]  ;;  %v192_v27 = vld [vmem:[#allocation8 + $0x48] sm:$0xff]  ;;  %v175_v29 = vld [vmem:[#allocation7 + $0x40] sm:$0xff] }
  0x86   :  { %v619_v28 = vpack.c.bf16 %v174_v25, %v173_v23  ;;  %v176_v30 = vld [vmem:[#allocation7 + $0x48] sm:$0xff]  ;;  %v598_v32 = vpack.c.bf16 %v192_v27, %v191_v26  ;;  %v193_v34 = vld [vmem:[#allocation8 + $0x50] sm:$0xff]  ;;  %v194_v35 = vld [vmem:[#allocation8 + $0x58] sm:$0xff]  ;;  %p821_p3 = por %p820_p2, %p819_p1 }
  0x87   :  { %590 = vmatpush3.bf16.msra.mxu0 %v589_v12  ;;  %v622_v33 = vpack.c.bf16 %v176_v30, %v175_v29  ;;  %v177_v36 = vld [vmem:[#allocation7 + $0x50] sm:$0xff]  ;;  %v178_v37 = vld [vmem:[#allocation7 + $0x58] sm:$0xff]  ;;  %v601_v38 = vpack.c.bf16 %v194_v35, %v193_v34  ;;  %v195_v40 = vld [vmem:[#allocation8 + $0x60] sm:$0xff] }
  0x88   :  { %614 = vmatpush3.bf16.msra.mxu1 %v613_v14  ;;  %591 = vmatprep.subr.bf16.mxu0 %v856_v7  ;;  %v625_v39 = vpack.c.bf16 %v178_v37, %v177_v36  ;;  %v196_v41 = vld [vmem:[#allocation8 + $0x68] sm:$0xff]  ;;  %v179_v42 = vld [vmem:[#allocation7 + $0x60] sm:$0xff]  ;;  %v197_v46 = vld [vmem:[#allocation8 + $0x70] sm:$0xff]  ;;  %p822_p4 = pnand %p821_p3, %p815_p0 }
  0x89   :  { %615 = vmatprep.subr.bf16.mxu1 %v856_v7  ;;  %v180_v43 = vld [vmem:[#allocation7 + $0x68] sm:$0xff]  ;;  %v604_v44 = vpack.c.bf16 %v196_v41, %v195_v40  ;;  %v198_v47 = vld [vmem:[#allocation8 + $0x78] sm:$0xff]  ;;  %v181_v48 = vld [vmem:[#allocation7 + $0x70] sm:$0xff] }
  0x8a   :  { %v628_v45 = vpack.c.bf16 %v180_v43, %v179_v42  ;;  %v182_v49 = vld [vmem:[#allocation7 + $0x78] sm:$0xff]  ;;  %v607_v50 = vpack.c.bf16 %v198_v47, %v197_v46  ;;  %v354_v29 = vld [vmem:[#allocation11] sm:$0xff]  ;;  %v355_v30 = vld [vmem:[#allocation11 + $0x8] sm:$0xff] }
  0x8b   :  { %593 = vmatpush3.bf16.msra.mxu0 %v592_v18  ;;  %v631_v51 = vpack.c.bf16 %v182_v49, %v181_v48  ;;  %v458_v52 = vld [vmem:[#allocation5] ss:$0 sm:$0xff] }
  0x8c   :  { %617 = vmatpush3.bf16.msra.mxu1 %v616_v20  ;;  %594 = vmatprep.subr.bf16.mxu0 %v856_v7  ;;  %v357_v34 = vld [vmem:[#allocation11 + $0x18] sm:$0xff] }
  0x8d   :  { %618 = vmatprep.subr.bf16.mxu1 %v856_v7 }
  0x8f   :  { %596 = vmatpush3.bf16.msra.mxu0 %v595_v24 }
  0x90   :  { %620 = vmatpush3.bf16.msra.mxu1 %v619_v28  ;;  %597 = vmatprep.subr.bf16.mxu0 %v856_v7 }
  0x91   :  { %621 = vmatprep.subr.bf16.mxu1 %v856_v7 }
  0x93   :  { %599 = vmatpush3.bf16.msra.mxu0 %v598_v32  ;;  %v634_v32 = vpack.c.bf16 %v355_v30, %v354_v29 }
  0x94   :  { %623 = vmatpush3.bf16.msra.mxu1 %v622_v33  ;;  %600 = vmatprep.subr.bf16.mxu0 %v856_v7  ;;  %v356_v33 = vld [vmem:[#allocation11 + $0x10] sm:$0xff] }
  0x95   :  { %624 = vmatprep.subr.bf16.mxu1 %v856_v7  ;;  %v637_v35 = vpack.c.bf16 %v357_v34, %v356_v33 }
  0x97   :  { %602 = vmatpush3.bf16.msra.mxu0 %v601_v38  ;;  %v461_v38 = vld [vmem:[#allocation10] ss:$0 sm:$0xff] }
  0x98   :  { %626 = vmatpush3.bf16.msra.mxu1 %v625_v39  ;;  %603 = vmatprep.subr.bf16.mxu0 %v856_v7 }
  0x99   :  { %627 = vmatprep.subr.bf16.mxu1 %v856_v7 }
  0x9b   :  { %605 = vmatpush3.bf16.msra.mxu0 %v604_v44 }
  0x9c   :  { %629 = vmatpush3.bf16.msra.mxu1 %v628_v45  ;;  %606 = vmatprep.subr.bf16.mxu0 %v856_v7 }
  0x9d   :  { %630 = vmatprep.subr.bf16.mxu1 %v856_v7 }
  0x9f   :  { %608 = vmatpush3.bf16.msra.mxu0 %v607_v50 }
  0xa0   :  { %632 = vmatpush3.bf16.msra.mxu1 %v631_v51  ;;  %633 = vmatprep.subr.bf16.mxu0 %v856_v7 }
 0x100   :  { %v119_v53 = vpop.permute.xlu0 %118 }
 0x101   :  { %v127_v54 = vmul.f32 %v458_v52, %v119_v53 }
 0x103   :  { %v128_v55 = vmul.f32 0.63661975, %v127_v54 }
 0x105   :  { %v129_v56 = vadd.f32 0.5, %v128_v55 }
 0x107   :  { %v130_v57 = vfloor.f32 %v129_v56 }
 0x109   :  { %v131_v58 = vmul.f32 1.5703125, %v130_v57  ;;  %v133_v60 = vmul.f32 0.0004837513, %v130_v57  ;;  %v135_v62 = vmul.f32 7.54979e-08, %v130_v57  ;;  %v639_v5 = vtrunc.f32 %v130_v57 }
 0x10b   :  { %v132_v59 = vsub.f32 %v127_v54, %v131_v58  ;;  %v640_v12 = vcvt.f32.s32 %v639_v5 }
 0x10d   :  { %v134_v61 = vsub.f32 %v132_v59, %v133_v60  ;;  %v155_v18 = vand.u32 3, %v640_v12 }
 0x10f   :  { %v136_v63 = vsub.f32 %v134_v61, %v135_v62  ;;  %vm158_vm1 = vcmp.eq.s32.totalorder %v155_v18, 2  ;;  %vm157_vm2 = vcmp.eq.s32.totalorder %v155_v18, 1  ;;  %vm156_vm3 = vcmp.eq.s32.totalorder %v155_v18, 0 }
 0x111   :  { %v137_v0 = vmul.f32 %v136_v63, %v136_v63 }
 0x113   :  { %v138_v1 = vmul.f32 -0.00019515296, %v137_v0  ;;  %v145_v2 = vmul.f32 2.4433157e-05, %v137_v0  ;;  %v149_v11 = vmul.f32 %v137_v0, %v137_v0  ;;  %v151_v15 = vmul.f32 0.5, %v137_v0 }
 0x115   :  { %v139_v3 = vadd.f32 0.008332161, %v138_v1  ;;  %v460_v4 = vadd.f32 -0.0013887316, %v145_v2 }
 0x117   :  { %v140_v6 = vmul.f32 %v139_v3, %v137_v0  ;;  %v147_v8 = vmul.f32 %v460_v4, %v137_v0 }
 0x119   :  { %v459_v9 = vadd.f32 -0.16666655, %v140_v6  ;;  %v148_v10 = vadd.f32 0.041666646, %v147_v8 }
 0x11b   :  { %v142_v13 = vmul.f32 %v459_v9, %v137_v0  ;;  %v150_v14 = vmul.f32 %v149_v11, %v148_v10 }
 0x11d   :  { %v143_v16 = vmul.f32 %v142_v13, %v136_v63  ;;  %v152_v17 = vsub.f32 %v150_v14, %v151_v15 }
 0x11f   :  { %v144_v19 = vadd.f32 %v143_v16, %v136_v63  ;;  %v153_v20 = vadd.f32 1.0, %v152_v17 }
 0x121   :  { %v159_v21 = vsub.f32 0.0, %v144_v19  ;;  %v160_v22 = vsub.f32 0.0, %v153_v20 }
 0x123   :  { %v161_v23 = vsel %vm158_vm1, %v159_v21, %v160_v22  ;;  %v164_v24 = vsel %vm158_vm1, %v160_v22, %v144_v19 }
 0x124   :  { %v162_v25 = vsel %vm157_vm2, %v153_v20, %v161_v23  ;;  %v165_v26 = vsel %vm157_vm2, %v159_v21, %v164_v24 }
 0x125   :  { %v163_v27 = vsel %vm156_vm3, %v144_v19, %v162_v25  ;;  %v166_v28 = vsel %vm156_vm3, %v153_v20, %v165_v26 }
 0x126   :  { %537 = vmatmul.mubr.f32.vlgmr.msra.gmra.mrb[0].mxu0 %v163_v27  ;;  %572 = vmatmul.mubr.f32.vlgmr.msra.gmra.mrb[0].mxu1 %v166_v28 }
 0x127   :  { %582 = vmatprep.mubr.msk.f32.mxu0 %vm857_vm0, %v858_v31  ;;  %635 = vmatpush3.bf16.msra.mxu0 %v634_v32 }
 0x128   :  { %636 = vmatprep.subr.bf16.mxu0 %v856_v7  ;;  %v463_v7 = vld [vmem:[#allocation13] ss:$0 sm:$0xff] }
 0x12b   :  { %638 = vmatpush3.bf16.msra.mxu0 %v637_v35 }
 0x1f9   :  { %v265_v36 = vpop.f32.mrb[0].mxu0  ;;  %v335_v37 = vpop.f32.mrb[0].mxu1 }
 0x1fa   :  { %v336_v39 = vadd.f32 %v335_v37, %v265_v36  ;;  %v538_v40 = vpop.f32.mrb[1].mxu0  ;;  %v573_v41 = vpop.f32.mrb[1].mxu1 }
 0x1fc   :  { %v346_v42 = vadd.f32 %v461_v38, %v336_v39 }
 0x1fe   :  { %v462_v43 = vmul.f32 -1.442695, %v346_v42 }
 0x200   :  { %656 = vpow2.f32 %v462_v43 }
 0x20a   :  { %v657_v31 = vpop.eup %656 }
 0x20b   :  { %v350_v44 = vadd.f32 1.0, %v657_v31 }
 0x20d   :  { %658 = vrcp.f32 %v350_v44 }
 0x217   :  { %v659_v45 = vpop.eup %658 }
 0x218   :  { %v353_v46 = vmul.f32 %v659_v45, %v346_v42 }
 0x21a   :  { %583 = vmatmul.mubr.msk.f32.vlgmr.msra.gmra.mrb[2].mxu0 %vm365_vm4, %v353_v46 }
 0x2ed   :  { %v435_v47 = vpop.f32.mrb[2].mxu0 }
 0x2ee   :  { %v436_v48 = vadd.f32 %v463_v7, %v435_v47  ;;  %v584_v49 = vpop.f32.mrb[3].mxu0 }
 0x2f0   :  { %439 = vst.msk [vmem:[#allocation14] sm:$0xff] %vm365_vm4, %v436_v48 }
 0x2f1   :  { %825 = shalt.err (!%p822_p4)
}
 0x2f2   :  { %s826_s15 = scalar_lea.hbm %s1036_s7, 128 }
 0x2f3   :  { %p827_p5 = scmp.ne.s32.totalorder %s1036_s7, %s826_s15  ;;  %p830_p6 = scmp.lt.u32.totalorder %s826_s15, %s1036_s7 }
 0x2f5   :  { %p832_p7 = pnand %p830_p6, %p827_p5 }
 0x2f7   :  { %835 = shalt.err (!%p832_p7)
}
 0x2f8   :  { %449 = dma.vmem_to_hbm [thread:$0]  %s447_s13, 128, %s1036_s7, [#allocation4]  }
 0x2f9   :  { %844 = dma.done.wait [#allocation4], 128  }
 0x2fa   :  { %845 = vsyncadd [#allocation4], 4294967168 }
 0x2fb   :  { %453 = vsyncpa [#allocation3], 1 }
 0x2fc   :  { %454 = vsyncpa [#allocation6], 1 }
 0x2fd   :  { %455 = vsyncpa [#allocation9], 1 }
 0x2fe   :  { %456 = vsyncpa [#allocation12], 1 }
 0x2ff   :  { %457 = vsyncpa [#allocation4], 1 }

</bundles_post_ra>
